<compile_context>
chip_gen: v7x
topology: tpu7x:2x2x1
jax: 0.10.0
libtpu: 0.0.40
codegen_flags: <defaults>
</compile_context>

<pallas_src>
import functools

import jax
import jax.numpy as jnp
from jax.experimental import pallas as pl
from jax.experimental.pallas import tpu as pltpu

LEAKY_SLOPE = 0.01   # nn.LeakyReLU default
BN_EPS = 1e-5        # nn.BatchNorm1d default
LANE = 128           # TODO(synk): sweep 256-lane padding on v6e/v7x (2x256 MXU)
                     # when unpadded dims are already large.


def _round_up(x, m):
    return (x + m - 1) // m * m


# ---------------------------------------------------------------------------
# Generation info (best effort; safe fallbacks)
# ---------------------------------------------------------------------------
def _tpu_generation_info():
    """Return (num_tensorcores_per_chip, physical_vmem_bytes) best-effort."""
    num_tc, phys_vmem = 1, 128 * 1024 * 1024
    try:
        info = pltpu.get_tpu_info()
        phys_vmem = int(getattr(info, "vmem_capacity_bytes", phys_vmem))
        for name in ("num_cores", "tensorcore_count", "num_tensorcores",
                     "core_count"):
            v = getattr(info, name, None)
            if v:
                num_tc = int(v)
                break
    except Exception:
        pass
    try:
        kind = jax.devices()[0].device_kind.lower()
        if "7" in kind:                       # v7x: 2 TCs, 64 MiB VMEM per TC
            num_tc = max(num_tc, 2)
            phys_vmem = min(phys_vmem, 64 * 1024 * 1024)
    except Exception:
        pass
    return num_tc, phys_vmem


_NUM_TC, _PHYS_VMEM = _tpu_generation_info()


# ---------------------------------------------------------------------------
# Kernel
# ---------------------------------------------------------------------------
def _make_fc_kernel(n_layers):
    """h -> LeakyReLU(h @ W_i + b_i) for i < L-1, then h @ W_last + b_last."""

    def kernel(*refs):
        # refs = [x, w_0, b_0, w_1, b_1, ..., w_{L-1}, b_{L-1}, out]
        x_ref = refs[0]
        out_ref = refs[-1]
        h = x_ref[...]                       # bf16 activation tile
        for i in range(n_layers):
            w_ref = refs[1 + 2 * i]
            b_ref = refs[2 + 2 * i]
            # bf16 MXU matmul with f32 accumulation; bias/activation in f32.
            acc = jnp.dot(h, w_ref[...],
                          preferred_element_type=jnp.float32) + b_ref[...]
            if i < n_layers - 1:
                # Dropout is identity in eval mode; LeakyReLU = max(x, 0.01x).
                acc = jnp.maximum(acc, LEAKY_SLOPE * acc)
                # Only the bf16 copy lives across the layer boundary.
                h = acc.astype(jnp.bfloat16)
            else:
                out_ref[...] = acc.astype(out_ref.dtype)

    return kernel


# ---------------------------------------------------------------------------
# Parameter construction / BN folding / padding (host-side)
# ---------------------------------------------------------------------------
def init_fc_params(key, graph_dim, hidden_dim, n_layers, n_tasks):
    """Raw parameters matching the PyTorch module's eval-mode math.

    Linear weights stored as (in_features, out_features) (transpose of PyTorch);
    per-feature vectors are (1, features).  BatchNorm affine params / running
    stats are randomized (non-trivial) so the eval-mode BN folding is exercised.
    """
    params = []
    dims = []
    for i in range(n_layers):
        if i == 0:
            dims.append((graph_dim, hidden_dim, True))
        elif i == n_layers - 1:
            dims.append((hidden_dim, n_tasks, False))
        else:
            dims.append((hidden_dim, hidden_dim, True))

    for (fan_in, fan_out, has_bn) in dims:
        key, kw, kb, kg, kbe, km, kv = jax.random.split(key, 7)
        bound = 1.0 / jnp.sqrt(float(fan_in))
        w = jax.random.uniform(kw, (fan_in, fan_out), jnp.float32, -bound, bound)
        b = jax.random.uniform(kb, (1, fan_out), jnp.float32, -bound, bound)
        params += [w, b]
        if has_bn:
            params += [
                jax.random.uniform(kg, (1, fan_out), jnp.float32, 0.5, 1.5),  # gamma
                0.1 * jax.random.normal(kbe, (1, fan_out), jnp.float32),      # beta
                0.1 * jax.random.normal(km, (1, fan_out), jnp.float32),       # running_mean
                jax.random.uniform(kv, (1, fan_out), jnp.float32, 0.5, 1.5),  # running_var
            ]
    return params


def prepare_params(raw_params, n_layers, lane=LANE):
    """Fold eval-mode BN into the following Linear and pad to lane multiples.

    BN(eval): y = h*s + t with s = gamma*rsqrt(var+eps), t = beta - mean*s.
    Since BN follows LeakyReLU, it folds into the next Linear.
    Returns flat [W'_0(bf16, padded), b'_0(f32, padded), W'_1, b'_1, ...].
    """
    # TODO(synk): on v7x, optionally quantize the resident weights to fp8 with a
    # per-output-channel scale folded into the f32 bias path (halves resident
    # weight VMEM / weight DMA); validate accuracy against the f32 reference.
    fused = []
    idx = 0
    scale = None   # (in_dim,)   pending BN scale from previous block
    shift = None   # (1, in_dim) pending BN shift from previous block
    for i in range(n_layers):
        w = raw_params[idx]
        b = raw_params[idx + 1]
        idx += 2
        if scale is not None:
            b = shift @ w + b           # uses the original W
            w = scale[:, None] * w
        if i < n_layers - 1:
            gamma, beta, rm, rv = raw_params[idx:idx + 4]
            idx += 4
            s = gamma * jax.lax.rsqrt(rv + BN_EPS)   # (1, F)
            scale = s[0]                              # (F,)
            shift = beta - rm * s                     # (1, F)
        fused.append((w, b))

    flat = []
    for w, b in fused:
        kin, kout = w.shape
        kin_p, kout_p = _round_up(kin, lane), _round_up(kout, lane)
        w_p = jnp.pad(w, ((0, kin_p - kin), (0, kout_p - kout)))
        b_p = jnp.pad(b, ((0, 0), (0, kout_p - kout)))
        flat += [w_p.astype(jnp.bfloat16), b_p.astype(jnp.float32)]
    return flat


# ---------------------------------------------------------------------------
# Tile / grid selection
# ---------------------------------------------------------------------------
def _select_tile(batch, tile_b, num_tc):
    """Pick (tb, batch_pad, n_steps): one step for small batches, deep tiles for
    large ones (low padding waste), >= num_tc programs on multi-TC chips."""
    batch8 = _round_up(batch, 8)
    tb_max = max(8, _round_up(tile_b, 8))
    n = pl.cdiv(batch8, tb_max)
    if num_tc > 1 and batch8 >= 2 * 8:
        n = max(n, num_tc)                    # let "parallel" shard across TCs
    tb = _round_up(pl.cdiv(batch8, n), 8)     # even split, low padding waste
    n = pl.cdiv(batch8, tb)
    return tb, n * tb, n


# ---------------------------------------------------------------------------
# Forward wrapper
# ---------------------------------------------------------------------------
@functools.partial(jax.jit, static_argnames=("n_layers", "n_tasks", "tile_b"))
def fc_forward(x, prepared, *, n_layers, n_tasks, tile_b=512):
    ws = prepared[0::2]
    bs = prepared[1::2]
    in_pad = ws[0].shape[0]
    out_pad = ws[-1].shape[1]

    batch, in_dim = x.shape
    tb, batch_pad, n_steps = _select_tile(batch, tile_b, _NUM_TC)
    grid = (n_steps,)

    # Input tile is bf16 (halves input HBM DMA and buffered tile VMEM); padded
    # zeros cast exactly, and the MXU LHS was bf16 anyway.
    x_p = jnp.pad(x.astype(jnp.bfloat16),
                  ((0, batch_pad - batch), (0, in_pad - in_dim)))

    # Activation tiles stream through VMEM (double-buffered by the pipeline);
    # weights/biases use constant index_maps so they stay VMEM-resident.
    in_specs = [pl.BlockSpec((tb, in_pad), lambda i: (i, 0))]
    for w, b in zip(ws, bs):
        in_specs.append(pl.BlockSpec(w.shape, lambda i: (0, 0)))
        in_specs.append(pl.BlockSpec(b.shape, lambda i: (0, 0)))
    out_specs = pl.BlockSpec((tb, out_pad), lambda i: (i, 0))

    # Cost estimate + VMEM budget.
    flops = 0
    param_bytes = 0
    for w, b in zip(ws, bs):
        flops += 2 * batch_pad * w.shape[0] * w.shape[1]
        param_bytes += w.size * w.dtype.itemsize + b.size * b.dtype.itemsize
    bytes_accessed = x_p.size * 2 + batch_pad * out_pad * 4 + param_bytes

    widest = max(w.shape[1] for w in ws)
    vmem_need = (2 * param_bytes               # params (count pipeline 2x bufs)
                 + 2 * tb * in_pad * 2         # double-buffered bf16 input tile
                 + 2 * tb * out_pad * 4        # double-buffered f32 output tile
                 + tb * widest * 4             # f32 accumulator
                 + tb * widest * 2)            # bf16 inter-layer activation
    # Always set an explicit limit (v5e's default scoped limit is only 16 MiB);
    # cap generation-aware: leave headroom on 64-MiB-VMEM chips (v7x).
    cap = 48 * 1024 * 1024 if _PHYS_VMEM <= 64 * 1024 * 1024 else 100 * 1024 * 1024
    vmem_limit = min(cap, max(int(vmem_need * 5 // 4), 16 * 1024 * 1024))
    # TODO(synk): if 2*param_bytes exceeds the cap (very large hidden_dim),
    # stream weights per layer (memory_space=pl.ANY + manual double-buffered
    # DMA / emit_pipeline) instead of relying on the scoped limit.

    out = pl.pallas_call(
        _make_fc_kernel(n_layers),
        out_shape=jax.ShapeDtypeStruct((batch_pad, out_pad), jnp.float32),
        grid=grid,
        in_specs=in_specs,
        out_specs=out_specs,
        compiler_params=pltpu.CompilerParams(
            dimension_semantics=("parallel",),
            vmem_limit_bytes=vmem_limit),
        cost_estimate=pl.CostEstimate(
            flops=flops, transcendentals=0, bytes_accessed=bytes_accessed),
    )(x_p, *prepared)

    return out[:batch, :n_tasks]


# ---------------------------------------------------------------------------
# Pure-JAX references
# ---------------------------------------------------------------------------
def fc_forward_ref(x, raw_params, n_layers):
    """Unfused f32 reference of the module's eval-mode forward."""
    h = x.astype(jnp.float32)
    idx = 0
    for _ in range(n_layers - 1):
        w, b, g, beta, rm, rv = raw_params[idx:idx + 6]
        idx += 6
        h = h @ w + b
        h = jnp.where(h >= 0.0, h, LEAKY_SLOPE * h)
        h = (h - rm) / jnp.sqrt(rv + BN_EPS) * g + beta
    w, b = raw_params[idx:idx + 2]
    return h @ w + b


def fc_forward_fused_ref(x, prepared, n_layers, n_tasks):
    """Reference that mirrors the kernel's exact fused bf16/f32 arithmetic."""
    in_pad = prepared[0].shape[0]
    batch, in_dim = x.shape
    h = jnp.pad(x.astype(jnp.bfloat16), ((0, 0), (0, in_pad - in_dim)))
    acc = None
    for i in range(n_layers):
        w = prepared[2 * i]
        b = prepared[2 * i + 1]
        acc = jnp.dot(h, w, preferred_element_type=jnp.float32) + b
        if i < n_layers - 1:
            acc = jnp.maximum(acc, LEAKY_SLOPE * acc)
            h = acc.astype(jnp.bfloat16)
    return acc[:, :n_tasks]


if __name__ == "__main__":
    # Small, module-consistent shapes.
    graph_dim, hidden_dim, n_layers, dropout, n_tasks = 32, 32, 3, 0.2, 4
    batch = 64

    key = jax.random.PRNGKey(0)
    kx, kp = jax.random.split(key)
    x = jax.random.normal(kx, (batch, graph_dim), jnp.float32)
    raw_params = init_fc_params(kp, graph_dim, hidden_dim, n_layers, n_tasks)
    prepared = prepare_params(raw_params, n_layers)

    out = fc_forward(x, prepared, n_layers=n_layers, n_tasks=n_tasks)
    out = jax.block_until_ready(out)
    assert out.shape == (batch, n_tasks)

    # Tight check: same fused bf16/f32 arithmetic as the kernel.
    ref_fused = fc_forward_fused_ref(x, prepared, n_layers, n_tasks)
    assert jnp.allclose(out, ref_fused, atol=1e-4, rtol=1e-4), "mismatch vs fused ref"

    # Semantics check: unfused f32 module math (tolerance covers bf16 matmuls).
    ref = fc_forward_ref(x, raw_params, n_layers)
    assert jnp.allclose(out, ref, atol=3e-2, rtol=3e-2), "mismatch vs module reference"

    print("KERNEL_OK")
</pallas_src>

<mosaic_0001>
module attributes {stable_mosaic.version = 11 : i64} {
  func.func @kernel(%arg0: i32, %arg1: memref<64x128xbf16, #tpu.memory_space<vmem>>, %arg2: memref<128x128xbf16, #tpu.memory_space<vmem>>, %arg3: memref<1x128xf32, #tpu.memory_space<vmem>>, %arg4: memref<128x128xbf16, #tpu.memory_space<vmem>>, %arg5: memref<1x128xf32, #tpu.memory_space<vmem>>, %arg6: memref<128x128xbf16, #tpu.memory_space<vmem>>, %arg7: memref<1x128xf32, #tpu.memory_space<vmem>>, %arg8: memref<64x128xf32, #tpu.memory_space<vmem>>) attributes {dimension_semantics = [#tpu.dimension_semantics<parallel>], iteration_bounds = array<i64: 1>, scalar_prefetch = 0 : i64, scratch_operands = 0 : i64, tpu.core_type = #tpu.core_type<tc>, window_params = [{transform_indices = @transform_0, window_bounds = array<i64: 64, 128>}, {pipeline_mode = #tpu.pipeline_mode<synchronous>, transform_indices = @transform_1, window_bounds = array<i64: 128, 128>}, {pipeline_mode = #tpu.pipeline_mode<synchronous>, transform_indices = @transform_2, window_bounds = array<i64: 1, 128>}, {pipeline_mode = #tpu.pipeline_mode<synchronous>, transform_indices = @transform_3, window_bounds = array<i64: 128, 128>}, {pipeline_mode = #tpu.pipeline_mode<synchronous>, transform_indices = @transform_4, window_bounds = array<i64: 1, 128>}, {pipeline_mode = #tpu.pipeline_mode<synchronous>, transform_indices = @transform_5, window_bounds = array<i64: 128, 128>}, {pipeline_mode = #tpu.pipeline_mode<synchronous>, transform_indices = @transform_6, window_bounds = array<i64: 1, 128>}, {transform_indices = @transform_7, window_bounds = array<i64: 64, 128>}]} {
    %c0 = arith.constant 0 : index
    %c0_0 = arith.constant 0 : index
    %0 = vector.load %arg1[%c0, %c0_0] : memref<64x128xbf16, #tpu.memory_space<vmem>>, vector<64x128xbf16>
    %c0_1 = arith.constant 0 : index
    %c0_2 = arith.constant 0 : index
    %1 = vector.load %arg2[%c0_1, %c0_2] : memref<128x128xbf16, #tpu.memory_space<vmem>>, vector<128x128xbf16>
    %cst = arith.constant dense<0.000000e+00> : vector<64x128xf32>
    %2 = tpu.matmul %0, %1, %cst {dimension_numbers = #tpu.dot_dimension_numbers<[1], [0], [0], [1], [0, 0, 1, 1], [], []>} : vector<64x128xbf16>, vector<128x128xbf16>, vector<64x128xf32> -> vector<64x128xf32>
    %c0_3 = arith.constant 0 : index
    %c0_4 = arith.constant 0 : index
    %3 = vector.load %arg3[%c0_3, %c0_4] : memref<1x128xf32, #tpu.memory_space<vmem>>, vector<1x128xf32>
    %4 = vector.broadcast %3 : vector<1x128xf32> to vector<64x128xf32>
    %5 = arith.addf %2, %4 : vector<64x128xf32>
    %cst_5 = arith.constant 0.00999999977 : f32
    %6 = vector.broadcast %cst_5 : f32 to vector<64x128xf32>
    %7 = arith.mulf %6, %5 : vector<64x128xf32>
    %8 = arith.maximumf %5, %7 : vector<64x128xf32>
    %9 = arith.truncf %8 : vector<64x128xf32> to vector<64x128xbf16>
    %c0_6 = arith.constant 0 : index
    %c0_7 = arith.constant 0 : index
    %10 = vector.load %arg4[%c0_6, %c0_7] : memref<128x128xbf16, #tpu.memory_space<vmem>>, vector<128x128xbf16>
    %cst_8 = arith.constant dense<0.000000e+00> : vector<64x128xf32>
    %11 = tpu.matmul %9, %10, %cst_8 {dimension_numbers = #tpu.dot_dimension_numbers<[1], [0], [0], [1], [0, 0, 1, 1], [], []>} : vector<64x128xbf16>, vector<128x128xbf16>, vector<64x128xf32> -> vector<64x128xf32>
    %c0_9 = arith.constant 0 : index
    %c0_10 = arith.constant 0 : index
    %12 = vector.load %arg5[%c0_9, %c0_10] : memref<1x128xf32, #tpu.memory_space<vmem>>, vector<1x128xf32>
    %13 = vector.broadcast %12 : vector<1x128xf32> to vector<64x128xf32>
    %14 = arith.addf %11, %13 : vector<64x128xf32>
    %cst_11 = arith.constant 0.00999999977 : f32
    %15 = vector.broadcast %cst_11 : f32 to vector<64x128xf32>
    %16 = arith.mulf %15, %14 : vector<64x128xf32>
    %17 = arith.maximumf %14, %16 : vector<64x128xf32>
    %18 = arith.truncf %17 : vector<64x128xf32> to vector<64x128xbf16>
    %c0_12 = arith.constant 0 : index
    %c0_13 = arith.constant 0 : index
    %19 = vector.load %arg6[%c0_12, %c0_13] : memref<128x128xbf16, #tpu.memory_space<vmem>>, vector<128x128xbf16>
    %cst_14 = arith.constant dense<0.000000e+00> : vector<64x128xf32>
    %20 = tpu.matmul %18, %19, %cst_14 {dimension_numbers = #tpu.dot_dimension_numbers<[1], [0], [0], [1], [0, 0, 1, 1], [], []>} : vector<64x128xbf16>, vector<128x128xbf16>, vector<64x128xf32> -> vector<64x128xf32>
    %c0_15 = arith.constant 0 : index
    %c0_16 = arith.constant 0 : index
    %21 = vector.load %arg7[%c0_15, %c0_16] : memref<1x128xf32, #tpu.memory_space<vmem>>, vector<1x128xf32>
    %22 = vector.broadcast %21 : vector<1x128xf32> to vector<64x128xf32>
    %23 = arith.addf %20, %22 : vector<64x128xf32>
    %c0_17 = arith.constant 0 : index
    %c0_18 = arith.constant 0 : index
    %24 = vector.load %arg8[%c0_17, %c0_18] : memref<64x128xf32, #tpu.memory_space<vmem>>, vector<64x128xf32>
    tpu.vector_store %arg8[%c0_17, %c0_18], %23 {strides = array<i32>} : memref<64x128xf32, #tpu.memory_space<vmem>>, vector<64x128xf32>,
    return
  }
  func.func @transform_0(%arg0: i32) -> (i32, i32) {
    %c0_i32 = arith.constant 0 : i32
    %c0_i32_0 = arith.constant 0 : i32
    return %arg0, %c0_i32 : i32, i32
  }
  func.func @transform_1(%arg0: i32) -> (i32, i32) {
    %c0_i32 = arith.constant 0 : i32
    %c0_i32_0 = arith.constant 0 : i32
    %c0_i32_1 = arith.constant 0 : i32
    return %c0_i32, %c0_i32_0 : i32, i32
  }
  func.func @transform_2(%arg0: i32) -> (i32, i32) {
    %c0_i32 = arith.constant 0 : i32
    %c0_i32_0 = arith.constant 0 : i32
    %c0_i32_1 = arith.constant 0 : i32
    return %c0_i32, %c0_i32_0 : i32, i32
  }
  func.func @transform_3(%arg0: i32) -> (i32, i32) {
    %c0_i32 = arith.constant 0 : i32
    %c0_i32_0 = arith.constant 0 : i32
    %c0_i32_1 = arith.constant 0 : i32
    return %c0_i32, %c0_i32_0 : i32, i32
  }
  func.func @transform_4(%arg0: i32) -> (i32, i32) {
    %c0_i32 = arith.constant 0 : i32
    %c0_i32_0 = arith.constant 0 : i32
    %c0_i32_1 = arith.constant 0 : i32
    return %c0_i32, %c0_i32_0 : i32, i32
  }
  func.func @transform_5(%arg0: i32) -> (i32, i32) {
    %c0_i32 = arith.constant 0 : i32
    %c0_i32_0 = arith.constant 0 : i32
    %c0_i32_1 = arith.constant 0 : i32
    return %c0_i32, %c0_i32_0 : i32, i32
  }
  func.func @transform_6(%arg0: i32) -> (i32, i32) {
    %c0_i32 = arith.constant 0 : i32
    %c0_i32_0 = arith.constant 0 : i32
    %c0_i32_1 = arith.constant 0 : i32
    return %c0_i32, %c0_i32_0 : i32, i32
  }
  func.func @transform_7(%arg0: i32) -> (i32, i32) {
    %c0_i32 = arith.constant 0 : i32
    %c0_i32_0 = arith.constant 0 : i32
    return %arg0, %c0_i32 : i32, i32
  }
}

</mosaic_0001>

<bundles_post_ra>
// kernel: fc_forward.1
= control target key start
LH: loop header
LB: loop body
LE: loop exit
PB: predicated region body
PF: predicated region fallthrough
CT: control target
= control target key end

     0   :  { %12 = vsyncpa [#allocation3], 0  ;;  %s744_s24 = smov [#allocation2]   ;;  %s892_s0 = inlined_call_operand.vmem [shape: bf16[64,128], index: 0, kind: input, shape index: {}]   ;;  %s893_s1 = inlined_call_operand.vmem [shape: bf16[128,128], index: 1, kind: input, shape index: {}]   ;;  %s894_s2 = inlined_call_operand.vmem [shape: f32[1,128], index: 2, kind: input, shape index: {}]   ;;  %s895_s3 = inlined_call_operand.vmem [shape: bf16[128,128], index: 3, kind: input, shape index: {}]   ;;  %s896_s4 = inlined_call_operand.vmem [shape: f32[1,128], index: 4, kind: input, shape index: {}]   ;;  %s897_s5 = inlined_call_operand.hbm [shape: bf16[128,128], index: 5, kind: input, shape index: {}]   ;;  %s898_s6 = inlined_call_operand.vmem [shape: f32[1,128], index: 6, kind: input, shape index: {}]   ;;  %s899_s7 = inlined_call_operand.vmem [shape: f32[64,128], index: 7, kind: output, shape index: {}]  }
   0x1   :  { %s28_s25 = sshll.u32 %s744_s24, 4  ;;  %s720_s28 = scalar_lea.hbm %s897_s5, 1024  ;;  %s29_s25 = int_to_ptr.vmem [resolvable:$true] %s28_s25 }
   0x2   :  { %p721_p0 = scmp.ne.s32.totalorder %s897_s5, %s720_s28  ;;  %p724_p1 = scmp.lt.u32.totalorder %s720_s28, %s897_s5 }
   0x4   :  { %p726_p2 = pnand %p724_p1, %p721_p0 }
   0x6   :  { %729 = shalt.err (!%p726_p2)
}
   0x7   :  { %s730_s10 = scalar_lea.vmem %s29_s25, 1024  ;;  %p735_p4 = scmp.lt.s32.totalorder %s29_s25, %s29_s25 }
   0x8   :  { %p731_p3 = scmp.ne.s32.totalorder %s29_s25, %s730_s10  ;;  %p736_p5 = scmp.lt.s32.totalorder %s730_s10, %s730_s10 }
   0xa   :  { %p737_p6 = por %p736_p5, %p735_p4 }
   0xc   :  { %p738_p7 = pnand %p737_p6, %p731_p3 }
   0xe   :  { %741 = shalt.err (!%p738_p7)
}
   0xf   :  { %s745_s11 = smov 64   ;;  %s746_s12 = smov 4  }
  0x10   :  { %34 = dma.hbm_to_vmem [thread:$0]  %s897_s5, 1024, %s29_s25, [#allocation3], %s745_s11, %s745_s11, %s746_s12  }
  0x11   :  { %742 = dma.done.wait [#allocation3], 1024  }
  0x12   :  { %743 = vsyncadd [#allocation3], 4294966272  ;;  %v692_v0 = vld [vmem:[%s893_s1] sm:$0xff]   ;;  %v693_v1 = vld [vmem:[%s893_s1 + $0x8] sm:$0xff]  }
  0x13   :  { %601 = vmatprep.subr.bf16.mxu0 %v692_v0  ;;  %v694_v2 = vld [vmem:[%s893_s1 + $0x10] sm:$0xff]   ;;  %v695_v3 = vld [vmem:[%s893_s1 + $0x18] sm:$0xff]   ;;  %v700_v4 = vld [vmem:[%s892_s0] sm:$0xff]  }
  0x14   :  { %602 = vmatpush3.bf16.msra.mxu0 %v692_v0  ;;  %617 = vmatprep.mubr.bf16.mxu0 %v700_v4  ;;  %v696_v5 = vld [vmem:[%s893_s1 + $0x20] sm:$0xff]   ;;  %v705_v7 = vld [vmem:[%s895_s3 + $0x8] sm:$0xff]   ;;  %v706_v9 = vld [vmem:[%s895_s3 + $0x10] sm:$0xff]  }
  0x15   :  { %603 = vmatprep.subr.bf16.mxu0 %v693_v1  ;;  %v704_v6 = vld [vmem:[%s895_s3] sm:$0xff]   ;;  %v697_v8 = vld [vmem:[%s893_s1 + $0x28] sm:$0xff]   ;;  %v698_v10 = vld [vmem:[%s893_s1 + $0x30] sm:$0xff]  }
  0x16   :  { %625 = vmatprep.subr.bf16.mxu1 %v704_v6  ;;  %v707_v11 = vld [vmem:[%s895_s3 + $0x18] sm:$0xff]   ;;  %v708_v13 = vld [vmem:[%s895_s3 + $0x20] sm:$0xff]   ;;  %v701_v14 = vld [vmem:[%s892_s0 + $0x8] sm:$0xff]  }
  0x17   :  { %626 = vmatpush3.bf16.msra.mxu1 %v704_v6  ;;  %v699_v12 = vld [vmem:[%s893_s1 + $0x38] sm:$0xff]   ;;  %v702_v15 = vld [vmem:[%s892_s0 + $0x10] sm:$0xff]   ;;  %v709_v17 = vld [vmem:[%s895_s3 + $0x28] sm:$0xff]  }
  0x18   :  { %604 = vmatpush3.bf16.msra.mxu0 %v693_v1  ;;  %627 = vmatprep.subr.bf16.mxu1 %v705_v7  ;;  %v703_v16 = vld [vmem:[%s892_s0 + $0x18] sm:$0xff]   ;;  %v710_v18 = vld [vmem:[%s895_s3 + $0x30] sm:$0xff]   ;;  %v712_v20 = vld [vmem:[#allocation2] sm:$0xff]  }
  0x19   :  { %605 = vmatprep.subr.bf16.mxu0 %v694_v2  ;;  %v711_v19 = vld [vmem:[%s895_s3 + $0x38] sm:$0xff]   ;;  %v713_v21 = vld [vmem:[#allocation2 + $0x8] sm:$0xff]   ;;  %v714_v22 = vld [vmem:[#allocation2 + $0x10] sm:$0xff]  }
  0x1a   :  { %v715_v23 = vld [vmem:[#allocation2 + $0x18] sm:$0xff]   ;;  %v716_v24 = vld [vmem:[#allocation2 + $0x20] sm:$0xff]   ;;  %v717_v62 = vld [vmem:[#allocation2 + $0x28] sm:$0xff]  }
  0x1b   :  { %628 = vmatpush3.bf16.msra.mxu1 %v705_v7  ;;  %v534_v25 = vld [vmem:[%s894_s2] ss:$0 sm:$0xff]  ;;  %v718_v63 = vld [vmem:[#allocation2 + $0x30] sm:$0xff]   ;;  %v719_v0 = vld [vmem:[#allocation2 + $0x38] sm:$0xff]  }
  0x1c   :  { %606 = vmatpush3.bf16.msra.mxu0 %v694_v2  ;;  %629 = vmatprep.subr.bf16.mxu1 %v706_v9  ;;  %v547_v1 = vld [vmem:[%s896_s4] ss:$0 sm:$0xff] }
  0x1d   :  { %607 = vmatprep.subr.bf16.mxu0 %v695_v3 }
  0x1f   :  { %630 = vmatpush3.bf16.msra.mxu1 %v706_v9 }
  0x20   :  { %608 = vmatpush3.bf16.msra.mxu0 %v695_v3  ;;  %631 = vmatprep.subr.bf16.mxu1 %v707_v11 }
  0x21   :  { %609 = vmatprep.subr.bf16.mxu0 %v696_v5 }
  0x23   :  { %632 = vmatpush3.bf16.msra.mxu1 %v707_v11 }
  0x24   :  { %610 = vmatpush3.bf16.msra.mxu0 %v696_v5  ;;  %633 = vmatprep.subr.bf16.mxu1 %v708_v13 }
  0x25   :  { %611 = vmatprep.subr.bf16.mxu0 %v697_v8 }
  0x27   :  { %634 = vmatpush3.bf16.msra.mxu1 %v708_v13 }
  0x28   :  { %612 = vmatpush3.bf16.msra.mxu0 %v697_v8  ;;  %635 = vmatprep.subr.bf16.mxu1 %v709_v17 }
  0x29   :  { %613 = vmatprep.subr.bf16.mxu0 %v698_v10 }
  0x2b   :  { %636 = vmatpush3.bf16.msra.mxu1 %v709_v17 }
  0x2c   :  { %614 = vmatpush3.bf16.msra.mxu0 %v698_v10  ;;  %637 = vmatprep.subr.bf16.mxu1 %v710_v18 }
  0x2d   :  { %615 = vmatprep.subr.bf16.mxu0 %v699_v12 }
  0x2f   :  { %638 = vmatpush3.bf16.msra.mxu1 %v710_v18 }
  0x30   :  { %616 = vmatpush3.bf16.msra.mxu0 %v699_v12  ;;  %639 = vmatprep.subr.bf16.mxu1 %v711_v19 }
  0x31   :  { %649 = vmatprep.subr.bf16.mxu0 %v712_v20 }
  0x33   :  { %618 = vmatmul.mubr.bf16.vlgmr.msra.gmra.mrb[0].mxu0 %v701_v14  ;;  %640 = vmatpush3.bf16.msra.mxu1 %v711_v19 }
  0x34   :  { %621 = vmatprep.mubr.bf16.mxu0 %v702_v15  ;;  %673 = vmatprep.subr.bf16.mxu1 %v712_v20 }
  0x35   :  { %650 = vmatpush3.bf16.msra.mxu0 %v712_v20 }
  0x36   :  { %651 = vmatprep.subr.bf16.mxu0 %v713_v21 }
  0x39   :  { %652 = vmatpush3.bf16.msra.mxu0 %v713_v21 }
  0x3a   :  { %653 = vmatprep.subr.bf16.mxu0 %v714_v22 }
  0x3b   :  { %622 = vmatmul.mubr.bf16.gmra.mrb[4].mxu0 %v703_v16 }
  0x3d   :  { %654 = vmatpush3.bf16.msra.mxu0 %v714_v22 }
  0x3e   :  { %655 = vmatprep.subr.bf16.mxu0 %v715_v23 }
  0x41   :  { %656 = vmatpush3.bf16.msra.mxu0 %v715_v23 }
  0x42   :  { %657 = vmatprep.subr.bf16.mxu0 %v716_v24 }
  0x45   :  { %658 = vmatpush3.bf16.msra.mxu0 %v716_v24 }
  0x46   :  { %659 = vmatprep.subr.bf16.mxu0 %v717_v62 }
  0x49   :  { %660 = vmatpush3.bf16.msra.mxu0 %v717_v62 }
  0x4a   :  { %661 = vmatprep.subr.bf16.mxu0 %v718_v63 }
  0x4d   :  { %662 = vmatpush3.bf16.msra.mxu0 %v718_v63 }
  0x4e   :  { %663 = vmatprep.subr.bf16.mxu0 %v719_v0 }
  0x51   :  { %664 = vmatpush3.bf16.msra.mxu0 %v719_v0 }
 0x106   :  { %v619_v26 = vpop.f32.mrb[0].mxu0 }
 0x107   :  { %v187_v27 = vadd.f32 %v619_v26, %v534_v25  ;;  %v178_v28 = vpop.f32.mrb[1].mxu0 }
 0x108   :  { %v179_v29 = vadd.f32 %v534_v25, %v178_v28  ;;  %v620_v30 = vpop.f32.mrb[2].mxu0 }
 0x109   :  { %v211_v31 = vmul.f32 0.01, %v187_v27  ;;  %v190_v32 = vadd.f32 %v620_v30, %v534_v25  ;;  %v181_v33 = vpop.f32.mrb[3].mxu0 }
 0x10a   :  { %v209_v34 = vmul.f32 0.01, %v179_v29  ;;  %v182_v35 = vadd.f32 %v534_v25, %v181_v33 }
 0x10b   :  { %v212_v36 = vmul.f32 0.01, %v190_v32  ;;  %v219_v38 = vmax.f32 %v187_v27, %v211_v31 }
 0x10c   :  { %v210_v37 = vmul.f32 0.01, %v182_v35  ;;  %v217_v41 = vmax.f32 %v179_v29, %v209_v34 }
 0x10d   :  { %v220_v39 = vmax.f32 %v190_v32, %v212_v36 }
 0x10e   :  { %v623_v40 = vpop.f32.mrb[4].mxu0  ;;  %v218_v42 = vmax.f32 %v182_v35, %v210_v37 }
 0x10f   :  { %v203_v43 = vadd.f32 %v623_v40, %v534_v25  ;;  %v194_v44 = vpop.f32.mrb[5].mxu0  ;;  %v226_v45 = vpack.c.bf16 %v220_v39, %v219_v38  ;;  %v556_v38 = vld [vmem:[%s898_s6] ss:$0 sm:$0xff] }
 0x110   :  { %v195_v46 = vadd.f32 %v534_v25, %v194_v44  ;;  %v624_v47 = vpop.f32.mrb[6].mxu0  ;;  %v225_v48 = vpack.c.bf16 %v218_v42, %v217_v41 }
 0x111   :  { %v215_v49 = vmul.f32 0.01, %v203_v43  ;;  %v206_v50 = vadd.f32 %v624_v47, %v534_v25  ;;  %v197_v51 = vpop.f32.mrb[7].mxu0 }
 0x112   :  { %v213_v52 = vmul.f32 0.01, %v195_v46  ;;  %v198_v53 = vadd.f32 %v534_v25, %v197_v51  ;;  %641 = vmatprep.mubr.bf16.mxu1 %v225_v48 }
 0x113   :  { %v216_v54 = vmul.f32 0.01, %v206_v50  ;;  %642 = vmatmul.mubr.bf16.vlgmr.msra.gmra.mrb[0].mxu1 %v226_v45  ;;  %v223_v56 = vmax.f32 %v203_v43, %v215_v49 }
 0x114   :  { %v214_v55 = vmul.f32 0.01, %v198_v53  ;;  %681 = vmatpush3.bf16.msra.mxu1 %v712_v20  ;;  %v221_v58 = vmax.f32 %v195_v46, %v213_v52 }
 0x115   :  { %v224_v57 = vmax.f32 %v206_v50, %v216_v54  ;;  %674 = vmatprep.subr.bf16.mxu1 %v713_v21 }
 0x116   :  { %v222_v59 = vmax.f32 %v198_v53, %v214_v55 }
 0x117   :  { %v228_v60 = vpack.c.bf16 %v224_v57, %v223_v56 }
 0x118   :  { %v227_v61 = vpack.c.bf16 %v222_v59, %v221_v58  ;;  %682 = vmatpush3.bf16.msra.mxu1 %v713_v21 }
 0x119   :  { %675 = vmatprep.subr.bf16.mxu1 %v714_v22 }
 0x11a   :  { %645 = vmatprep.mubr.bf16.mxu1 %v227_v61 }
 0x11b   :  { %646 = vmatmul.mubr.bf16.gmra.mrb[4].mxu1 %v228_v60 }
 0x11c   :  { %683 = vmatpush3.bf16.msra.mxu1 %v714_v22 }
 0x11d   :  { %676 = vmatprep.subr.bf16.mxu1 %v715_v23 }
 0x120   :  { %684 = vmatpush3.bf16.msra.mxu1 %v715_v23 }
 0x121   :  { %677 = vmatprep.subr.bf16.mxu1 %v716_v24 }
 0x124   :  { %685 = vmatpush3.bf16.msra.mxu1 %v716_v24 }
 0x125   :  { %678 = vmatprep.subr.bf16.mxu1 %v717_v62 }
 0x128   :  { %686 = vmatpush3.bf16.msra.mxu1 %v717_v62 }
 0x129   :  { %679 = vmatprep.subr.bf16.mxu1 %v718_v63 }
 0x12c   :  { %687 = vmatpush3.bf16.msra.mxu1 %v718_v63 }
 0x12d   :  { %680 = vmatprep.subr.bf16.mxu1 %v719_v0 }
 0x130   :  { %688 = vmatpush3.bf16.msra.mxu1 %v719_v0 }
 0x1e6   :  { %v643_v2 = vpop.f32.mrb[0].mxu1 }
 0x1e7   :  { %v343_v3 = vadd.f32 %v643_v2, %v547_v1  ;;  %v334_v4 = vpop.f32.mrb[1].mxu1 }
 0x1e8   :  { %v335_v5 = vadd.f32 %v547_v1, %v334_v4  ;;  %v644_v6 = vpop.f32.mrb[2].mxu1 }
 0x1e9   :  { %v367_v7 = vmul.f32 0.01, %v343_v3  ;;  %v346_v8 = vadd.f32 %v644_v6, %v547_v1  ;;  %v337_v9 = vpop.f32.mrb[3].mxu1 }
 0x1ea   :  { %v365_v10 = vmul.f32 0.01, %v335_v5  ;;  %v338_v11 = vadd.f32 %v547_v1, %v337_v9 }
 0x1eb   :  { %v368_v12 = vmul.f32 0.01, %v346_v8  ;;  %v375_v14 = vmax.f32 %v343_v3, %v367_v7 }
 0x1ec   :  { %v366_v13 = vmul.f32 0.01, %v338_v11  ;;  %v373_v16 = vmax.f32 %v335_v5, %v365_v10 }
 0x1ed   :  { %v376_v15 = vmax.f32 %v346_v8, %v368_v12 }
 0x1ee   :  { %v374_v17 = vmax.f32 %v338_v11, %v366_v13  ;;  %v647_v18 = vpop.f32.mrb[4].mxu1 }
 0x1ef   :  { %v382_v19 = vpack.c.bf16 %v376_v15, %v375_v14  ;;  %v359_v20 = vadd.f32 %v647_v18, %v547_v1  ;;  %v350_v21 = vpop.f32.mrb[5].mxu1 }
 0x1f0   :  { %v351_v22 = vadd.f32 %v547_v1, %v350_v21  ;;  %v648_v23 = vpop.f32.mrb[6].mxu1  ;;  %v381_v24 = vpack.c.bf16 %v374_v17, %v373_v16 }
 0x1f1   :  { %v371_v25 = vmul.f32 0.01, %v359_v20  ;;  %v362_v26 = vadd.f32 %v648_v23, %v547_v1  ;;  %v353_v27 = vpop.f32.mrb[7].mxu1 }
 0x1f2   :  { %v369_v28 = vmul.f32 0.01, %v351_v22  ;;  %v354_v29 = vadd.f32 %v547_v1, %v353_v27  ;;  %665 = vmatprep.mubr.bf16.mxu0 %v381_v24 }
 0x1f3   :  { %v372_v30 = vmul.f32 0.01, %v362_v26  ;;  %666 = vmatmul.mubr.bf16.vlgmr.msra.gmra.mrb[8].mxu0 %v382_v19  ;;  %v379_v32 = vmax.f32 %v359_v20, %v371_v25 }
 0x1f4   :  { %v370_v31 = vmul.f32 0.01, %v354_v29  ;;  %v377_v34 = vmax.f32 %v351_v22, %v369_v28 }
 0x1f5   :  { %v380_v33 = vmax.f32 %v362_v26, %v372_v30 }
 0x1f6   :  { %v378_v35 = vmax.f32 %v354_v29, %v370_v31 }
 0x1f7   :  { %v384_v36 = vpack.c.bf16 %v380_v33, %v379_v32 }
 0x1f8   :  { %v383_v37 = vpack.c.bf16 %v378_v35, %v377_v34 }
 0x1fa   :  { %669 = vmatprep.mubr.bf16.mxu1 %v383_v37 }
 0x1fb   :  { %670 = vmatmul.mubr.bf16.vlgmr.msra.gmra.mrb[8].mxu1 %v384_v36 }
 0x2c6   :  { %v667_v39 = vpop.f32.mrb[8].mxu0 }
 0x2c7   :  { %v499_v40 = vadd.f32 %v667_v39, %v556_v38  ;;  %v490_v41 = vpop.f32.mrb[9].mxu0 }
 0x2c8   :  { %v491_v42 = vadd.f32 %v556_v38, %v490_v41  ;;  %v668_v43 = vpop.f32.mrb[10].mxu0 }
 0x2c9   :  { %523 = vst [vmem:[%s899_s7 + $0x10] sm:$0xff] %v499_v40  ;;  %v502_v44 = vadd.f32 %v668_v43, %v556_v38  ;;  %v493_v45 = vpop.f32.mrb[11].mxu0 }
 0x2ca   :  { %521 = vst [vmem:[%s899_s7] sm:$0xff] %v491_v42  ;;  %v494_v46 = vadd.f32 %v556_v38, %v493_v45 }
 0x2cb   :  { %524 = vst [vmem:[%s899_s7 + $0x18] sm:$0xff] %v502_v44 }
 0x2cc   :  { %522 = vst [vmem:[%s899_s7 + $0x8] sm:$0xff] %v494_v46 }
 0x2ce   :  { %v671_v47 = vpop.f32.mrb[8].mxu1 }
 0x2cf   :  { %v515_v48 = vadd.f32 %v671_v47, %v556_v38  ;;  %v506_v49 = vpop.f32.mrb[9].mxu1 }
 0x2d0   :  { %v507_v50 = vadd.f32 %v556_v38, %v506_v49  ;;  %v672_v51 = vpop.f32.mrb[10].mxu1 }
 0x2d1   :  { %527 = vst [vmem:[%s899_s7 + $0x30] sm:$0xff] %v515_v48  ;;  %v518_v52 = vadd.f32 %v672_v51, %v556_v38  ;;  %v509_v53 = vpop.f32.mrb[11].mxu1 }
 0x2d2   :  { %525 = vst [vmem:[%s899_s7 + $0x20] sm:$0xff] %v507_v50  ;;  %v510_v54 = vadd.f32 %v556_v38, %v509_v53 }
 0x2d3   :  { %528 = vst [vmem:[%s899_s7 + $0x38] sm:$0xff] %v518_v52 }
 0x2d4   :  { %526 = vst [vmem:[%s899_s7 + $0x28] sm:$0xff] %v510_v54 }
 0x2d5   :  { %533 = vsyncpa [#allocation3], 1 }

</bundles_post_ra>
